<compile_context>
chip_gen: v5e
topology: v5e:2x2
jax: 0.10.0
libtpu: 0.0.40
codegen_flags: <defaults>
</compile_context>

<pallas_src>
import functools

import jax
import jax.numpy as jnp
from jax.experimental import pallas as pl
from jax.experimental.pallas import tpu as pltpu

# Example shapes: (batch, seq_len, channels).  C = 128 keeps the lane axis
# fully dense (one lane tile); B * L = 128 keeps sublanes tile-aligned.
B, L, C = 2, 64, 128
KERNEL_SIZE = 7            # odd -> AvgPool1d(stride=1, padding=K//2) preserves L
PAD = KERNEL_SIZE // 2


def _shift_rows(x, d, use_roll):
    """result[t] ~= x[t + d].  Rows whose source t + d falls outside [0, n)
    carry don't-care values; the caller masks them out."""
    if d == 0:
        return x
    n = x.shape[0]
    if use_roll:
        # Cyclic sublane rotation on the XLU -- wrapped rows are masked by the
        # caller, so the wrap-around is harmless.
        return pltpu.roll(x, shift=(-d) % n, axis=0)
    # Fallback: shifted static slice + zero fill (costs a sublane relayout).
    fill = jnp.zeros((abs(d),) + x.shape[1:], x.dtype)
    if d > 0:
        return jnp.concatenate([x[d:], fill], axis=0)
    return jnp.concatenate([fill, x[:n + d]], axis=0)


def _series_decomp_kernel(x_ref, seasonal_ref, trend_ref, *, seq_len,
                          kernel_size, use_roll):
    """x_ref: (B*L, C).  Batch folded onto rows; channels sit on lanes."""
    half = kernel_size // 2
    x = x_ref[...].astype(jnp.float32)
    # Position of each row inside its own sequence; this both implements the
    # zero-padding at the sequence edges and keeps taps from leaking across a
    # batch boundary after the (B, L) -> (B*L,) fold.
    pos = jax.lax.broadcasted_iota(jnp.int32, x.shape, 0) % seq_len

    acc = x                                        # centre tap (d = 0)
    for d in range(1, half + 1):
        # forward tap x[t + d]: valid while it stays inside this sequence
        acc = acc + jnp.where(pos < seq_len - d, _shift_rows(x, d, use_roll), 0.0)
        # backward tap x[t - d]
        acc = acc + jnp.where(pos >= d, _shift_rows(x, -d, use_roll), 0.0)

    # count_include_pad=True -> always divide by kernel_size (zero padding).
    trend = acc / float(kernel_size)
    trend_ref[...] = trend.astype(trend_ref.dtype)
    seasonal_ref[...] = (x - trend).astype(seasonal_ref.dtype)


@functools.partial(jax.jit, static_argnames=("use_roll",))
def _decompose(x, *, use_roll):
    b, seq_len, c = x.shape
    n = b * seq_len
    x2 = x.reshape(n, c)                   # free collapse of contiguous (B, L)

    kernel = functools.partial(_series_decomp_kernel, seq_len=seq_len,
                               kernel_size=KERNEL_SIZE, use_roll=use_roll)
    seasonal2, trend2 = pl.pallas_call(
        kernel,
        out_shape=(jax.ShapeDtypeStruct((n, c), x.dtype),
                   jax.ShapeDtypeStruct((n, c), x.dtype)),
        # No grid: single invocation, whole problem resident in VMEM.
        in_specs=[pl.BlockSpec(memory_space=pltpu.MemorySpace.VMEM)],
        out_specs=(pl.BlockSpec(memory_space=pltpu.MemorySpace.VMEM),
                   pl.BlockSpec(memory_space=pltpu.MemorySpace.VMEM)),
    )(x2)
    return seasonal2.reshape(b, seq_len, c), trend2.reshape(b, seq_len, c)


def series_decomposition(x):
    """x: (B, L, C) -> (seasonal, trend), both (B, L, C)."""
    try:
        return jax.block_until_ready(_decompose(x, use_roll=True))
    except Exception:
        # Insurance only: if pltpu.roll (sublane rotate) fails to lower on this
        # backend, retry with the slice-based shift (identical semantics).
        return jax.block_until_ready(_decompose(x, use_roll=False))


def reference(x):
    """Pure-JAX mirror of AvgPool1d(K, stride=1, padding=K//2) decomposition."""
    seq_len = x.shape[1]
    xp = jnp.pad(x, ((0, 0), (PAD, PAD), (0, 0)))
    trend = sum(xp[:, j:j + seq_len, :] for j in range(KERNEL_SIZE)) / KERNEL_SIZE
    return x - trend, trend


if __name__ == "__main__":
    key = jax.random.PRNGKey(0)
    x = jax.random.normal(key, (B, L, C), jnp.float32)

    seasonal, trend = series_decomposition(x)
    seasonal, trend = jax.block_until_ready((seasonal, trend))

    ref_seasonal, ref_trend = reference(x)
    assert seasonal.shape == (B, L, C) and trend.shape == (B, L, C)
    assert jnp.allclose(trend, ref_trend, atol=1e-5, rtol=1e-5)
    assert jnp.allclose(seasonal, ref_seasonal, atol=1e-5, rtol=1e-5)
    # The decomposition must reconstruct the input exactly.
    assert jnp.allclose(seasonal + trend, x, atol=1e-5, rtol=1e-5)

    print("KERNEL_OK")
</pallas_src>

<mosaic_0001>
module attributes {stable_mosaic.version = 11 : i64} {
  func.func @_series_decomp_kernel(%arg0: memref<128x128xf32, #tpu.memory_space<vmem>>, %arg1: memref<128x128xf32, #tpu.memory_space<vmem>>, %arg2: memref<128x128xf32, #tpu.memory_space<vmem>>) attributes {dimension_semantics = [], scalar_prefetch = 0 : i64, scratch_operands = 0 : i64, tpu.core_type = #tpu.core_type<tc>} {
    %c0 = arith.constant 0 : index
    %c0_0 = arith.constant 0 : index
    %0 = vector.load %arg0[%c0, %c0_0] : memref<128x128xf32, #tpu.memory_space<vmem>>, vector<128x128xf32>
    %1 = tpu.iota {dimensions = array<i32: 0>} : vector<128x128xi32>
    %c64_i32 = arith.constant 64 : i32
    %c0_i32 = arith.constant 0 : i32
    %2 = arith.cmpi eq, %c64_i32, %c0_i32 : i32
    %c1_i32 = arith.constant 1 : i32
    %3 = arith.select %2, %c1_i32, %c64_i32 : i32
    %4 = vector.broadcast %3 : i32 to vector<128x128xi32>
    %5 = arith.remsi %1, %4 : vector<128x128xi32>
    %c0_i32_1 = arith.constant 0 : i32
    %6 = vector.broadcast %c0_i32_1 : i32 to vector<128x128xi32>
    %7 = arith.cmpi ne, %5, %6 : vector<128x128xi32>
    %c0_i32_2 = arith.constant 0 : i32
    %8 = vector.broadcast %c0_i32_2 : i32 to vector<128x128xi32>
    %9 = arith.cmpi slt, %5, %8 : vector<128x128xi32>
    %c0_i32_3 = arith.constant 0 : i32
    %10 = arith.cmpi slt, %3, %c0_i32_3 : i32
    %11 = vector.broadcast %10 : i1 to vector<128x128xi1>
    %12 = vector.broadcast %11 : vector<128x128xi1> to vector<128x128xi1>
    %13 = arith.xori %9, %12 : vector<128x128xi1>
    %14 = arith.andi %13, %7 : vector<128x128xi1>
    %15 = vector.broadcast %3 : i32 to vector<128x128xi32>
    %16 = arith.addi %5, %15 : vector<128x128xi32>
    %17 = arith.select %14, %16, %5 : vector<128x128xi1>, vector<128x128xi32>
    %c63_i32 = arith.constant 63 : i32
    %18 = vector.broadcast %c63_i32 : i32 to vector<128x128xi32>
    %19 = arith.cmpi slt, %17, %18 : vector<128x128xi32>
    %c127_i32 = arith.constant 127 : i32
    %20 = tpu.dynamic_rotate %0 by %c127_i32 dim 0 : vector<128x128xf32>, i32 -> vector<128x128xf32>
    %cst = arith.constant 0.000000e+00 : f32
    %21 = vector.broadcast %cst : f32 to vector<128x128xf32>
    %22 = arith.select %19, %20, %21 : vector<128x128xi1>, vector<128x128xf32>
    %23 = arith.addf %0, %22 : vector<128x128xf32>
    %c1_i32_4 = arith.constant 1 : i32
    %24 = vector.broadcast %c1_i32_4 : i32 to vector<128x128xi32>
    %25 = arith.cmpi sge, %17, %24 : vector<128x128xi32>
    %c1_i32_5 = arith.constant 1 : i32
    %26 = tpu.dynamic_rotate %0 by %c1_i32_5 dim 0 : vector<128x128xf32>, i32 -> vector<128x128xf32>
    %cst_6 = arith.constant 0.000000e+00 : f32
    %27 = vector.broadcast %cst_6 : f32 to vector<128x128xf32>
    %28 = arith.select %25, %26, %27 : vector<128x128xi1>, vector<128x128xf32>
    %29 = arith.addf %23, %28 : vector<128x128xf32>
    %c62_i32 = arith.constant 62 : i32
    %30 = vector.broadcast %c62_i32 : i32 to vector<128x128xi32>
    %31 = arith.cmpi slt, %17, %30 : vector<128x128xi32>
    %c126_i32 = arith.constant 126 : i32
    %32 = tpu.dynamic_rotate %0 by %c126_i32 dim 0 : vector<128x128xf32>, i32 -> vector<128x128xf32>
    %cst_7 = arith.constant 0.000000e+00 : f32
    %33 = vector.broadcast %cst_7 : f32 to vector<128x128xf32>
    %34 = arith.select %31, %32, %33 : vector<128x128xi1>, vector<128x128xf32>
    %35 = arith.addf %29, %34 : vector<128x128xf32>
    %c2_i32 = arith.constant 2 : i32
    %36 = vector.broadcast %c2_i32 : i32 to vector<128x128xi32>
    %37 = arith.cmpi sge, %17, %36 : vector<128x128xi32>
    %c2_i32_8 = arith.constant 2 : i32
    %38 = tpu.dynamic_rotate %0 by %c2_i32_8 dim 0 : vector<128x128xf32>, i32 -> vector<128x128xf32>
    %cst_9 = arith.constant 0.000000e+00 : f32
    %39 = vector.broadcast %cst_9 : f32 to vector<128x128xf32>
    %40 = arith.select %37, %38, %39 : vector<128x128xi1>, vector<128x128xf32>
    %41 = arith.addf %35, %40 : vector<128x128xf32>
    %c61_i32 = arith.constant 61 : i32
    %42 = vector.broadcast %c61_i32 : i32 to vector<128x128xi32>
    %43 = arith.cmpi slt, %17, %42 : vector<128x128xi32>
    %c125_i32 = arith.constant 125 : i32
    %44 = tpu.dynamic_rotate %0 by %c125_i32 dim 0 : vector<128x128xf32>, i32 -> vector<128x128xf32>
    %cst_10 = arith.constant 0.000000e+00 : f32
    %45 = vector.broadcast %cst_10 : f32 to vector<128x128xf32>
    %46 = arith.select %43, %44, %45 : vector<128x128xi1>, vector<128x128xf32>
    %47 = arith.addf %41, %46 : vector<128x128xf32>
    %c3_i32 = arith.constant 3 : i32
    %48 = vector.broadcast %c3_i32 : i32 to vector<128x128xi32>
    %49 = arith.cmpi sge, %17, %48 : vector<128x128xi32>
    %c3_i32_11 = arith.constant 3 : i32
    %50 = tpu.dynamic_rotate %0 by %c3_i32_11 dim 0 : vector<128x128xf32>, i32 -> vector<128x128xf32>
    %cst_12 = arith.constant 0.000000e+00 : f32
    %51 = vector.broadcast %cst_12 : f32 to vector<128x128xf32>
    %52 = arith.select %49, %50, %51 : vector<128x128xi1>, vector<128x128xf32>
    %53 = arith.addf %47, %52 : vector<128x128xf32>
    %cst_13 = arith.constant 7.000000e+00 : f32
    %54 = vector.broadcast %cst_13 : f32 to vector<128x128xf32>
    %55 = arith.divf %53, %54 : vector<128x128xf32>
    %c0_14 = arith.constant 0 : index
    %c0_15 = arith.constant 0 : index
    %56 = vector.load %arg2[%c0_14, %c0_15] : memref<128x128xf32, #tpu.memory_space<vmem>>, vector<128x128xf32>
    tpu.vector_store %arg2[%c0_14, %c0_15], %55 {strides = array<i32>} : memref<128x128xf32, #tpu.memory_space<vmem>>, vector<128x128xf32>,
    %57 = arith.subf %0, %55 : vector<128x128xf32>
    %c0_16 = arith.constant 0 : index
    %c0_17 = arith.constant 0 : index
    %58 = vector.load %arg1[%c0_16, %c0_17] : memref<128x128xf32, #tpu.memory_space<vmem>>, vector<128x128xf32>
    tpu.vector_store %arg1[%c0_16, %c0_17], %57 {strides = array<i32>} : memref<128x128xf32, #tpu.memory_space<vmem>>, vector<128x128xf32>,
    return
  }
}

module attributes {stable_mosaic.version = 11 : i64} {
  func.func @_series_decomp_kernel(%arg0: memref<128x128xf32, #tpu.memory_space<vmem>>, %arg1: memref<128x128xf32, #tpu.memory_space<vmem>>, %arg2: memref<128x128xf32, #tpu.memory_space<vmem>>) attributes {dimension_semantics = [], scalar_prefetch = 0 : i64, scratch_operands = 0 : i64, tpu.core_type = #tpu.core_type<tc>} {
    %c0 = arith.constant 0 : index
    %c0_0 = arith.constant 0 : index
    %0 = vector.load %arg0[%c0, %c0_0] : memref<128x128xf32, #tpu.memory_space<vmem>>, vector<128x128xf32>
    %1 = tpu.iota {dimensions = array<i32: 0>} : vector<128x128xi32>
    %c64_i32 = arith.constant 64 : i32
    %c0_i32 = arith.constant 0 : i32
    %2 = arith.cmpi eq, %c64_i32, %c0_i32 : i32
    %c1_i32 = arith.constant 1 : i32
    %3 = arith.select %2, %c1_i32, %c64_i32 : i32
    %4 = vector.broadcast %3 : i32 to vector<128x128xi32>
    %5 = arith.remsi %1, %4 : vector<128x128xi32>
    %c0_i32_1 = arith.constant 0 : i32
    %6 = vector.broadcast %c0_i32_1 : i32 to vector<128x128xi32>
    %7 = arith.cmpi ne, %5, %6 : vector<128x128xi32>
    %c0_i32_2 = arith.constant 0 : i32
    %8 = vector.broadcast %c0_i32_2 : i32 to vector<128x128xi32>
    %9 = arith.cmpi slt, %5, %8 : vector<128x128xi32>
    %c0_i32_3 = arith.constant 0 : i32
    %10 = arith.cmpi slt, %3, %c0_i32_3 : i32
    %11 = vector.broadcast %10 : i1 to vector<128x128xi1>
    %12 = vector.broadcast %11 : vector<128x128xi1> to vector<128x128xi1>
    %13 = arith.xori %9, %12 : vector<128x128xi1>
    %14 = arith.andi %13, %7 : vector<128x128xi1>
    %15 = vector.broadcast %3 : i32 to vector<128x128xi32>
    %16 = arith.addi %5, %15 : vector<128x128xi32>
    %17 = arith.select %14, %16, %5 : vector<128x128xi1>, vector<128x128xi32>
    %c63_i32 = arith.constant 63 : i32
    %18 = vector.broadcast %c63_i32 : i32 to vector<128x128xi32>
    %19 = arith.cmpi slt, %17, %18 : vector<128x128xi32>
    %cst = arith.constant 0.000000e+00 : f32
    %20 = vector.broadcast %cst : f32 to vector<1x128xf32>
    %21 = vector.extract_strided_slice %0 {offsets = [1, 0], sizes = [127, 128], strides = [1, 1]} : vector<128x128xf32> to vector<127x128xf32>
    %22 = tpu.concatenate %21, %20 in 0 : vector<127x128xf32>, vector<1x128xf32> -> vector<128x128xf32>
    %cst_4 = arith.constant 0.000000e+00 : f32
    %23 = vector.broadcast %cst_4 : f32 to vector<128x128xf32>
    %24 = arith.select %19, %22, %23 : vector<128x128xi1>, vector<128x128xf32>
    %25 = arith.addf %0, %24 : vector<128x128xf32>
    %c1_i32_5 = arith.constant 1 : i32
    %26 = vector.broadcast %c1_i32_5 : i32 to vector<128x128xi32>
    %27 = arith.cmpi sge, %17, %26 : vector<128x128xi32>
    %cst_6 = arith.constant 0.000000e+00 : f32
    %28 = vector.broadcast %cst_6 : f32 to vector<1x128xf32>
    %29 = vector.extract_strided_slice %0 {offsets = [0, 0], sizes = [127, 128], strides = [1, 1]} : vector<128x128xf32> to vector<127x128xf32>
    %30 = tpu.concatenate %28, %29 in 0 : vector<1x128xf32>, vector<127x128xf32> -> vector<128x128xf32>
    %cst_7 = arith.constant 0.000000e+00 : f32
    %31 = vector.broadcast %cst_7 : f32 to vector<128x128xf32>
    %32 = arith.select %27, %30, %31 : vector<128x128xi1>, vector<128x128xf32>
    %33 = arith.addf %25, %32 : vector<128x128xf32>
    %c62_i32 = arith.constant 62 : i32
    %34 = vector.broadcast %c62_i32 : i32 to vector<128x128xi32>
    %35 = arith.cmpi slt, %17, %34 : vector<128x128xi32>
    %cst_8 = arith.constant 0.000000e+00 : f32
    %36 = vector.broadcast %cst_8 : f32 to vector<2x128xf32>
    %37 = vector.extract_strided_slice %0 {offsets = [2, 0], sizes = [126, 128], strides = [1, 1]} : vector<128x128xf32> to vector<126x128xf32>
    %38 = tpu.concatenate %37, %36 in 0 : vector<126x128xf32>, vector<2x128xf32> -> vector<128x128xf32>
    %cst_9 = arith.constant 0.000000e+00 : f32
    %39 = vector.broadcast %cst_9 : f32 to vector<128x128xf32>
    %40 = arith.select %35, %38, %39 : vector<128x128xi1>, vector<128x128xf32>
    %41 = arith.addf %33, %40 : vector<128x128xf32>
    %c2_i32 = arith.constant 2 : i32
    %42 = vector.broadcast %c2_i32 : i32 to vector<128x128xi32>
    %43 = arith.cmpi sge, %17, %42 : vector<128x128xi32>
    %cst_10 = arith.constant 0.000000e+00 : f32
    %44 = vector.broadcast %cst_10 : f32 to vector<2x128xf32>
    %45 = vector.extract_strided_slice %0 {offsets = [0, 0], sizes = [126, 128], strides = [1, 1]} : vector<128x128xf32> to vector<126x128xf32>
    %46 = tpu.concatenate %44, %45 in 0 : vector<2x128xf32>, vector<126x128xf32> -> vector<128x128xf32>
    %cst_11 = arith.constant 0.000000e+00 : f32
    %47 = vector.broadcast %cst_11 : f32 to vector<128x128xf32>
    %48 = arith.select %43, %46, %47 : vector<128x128xi1>, vector<128x128xf32>
    %49 = arith.addf %41, %48 : vector<128x128xf32>
    %c61_i32 = arith.constant 61 : i32
    %50 = vector.broadcast %c61_i32 : i32 to vector<128x128xi32>
    %51 = arith.cmpi slt, %17, %50 : vector<128x128xi32>
    %cst_12 = arith.constant 0.000000e+00 : f32
    %52 = vector.broadcast %cst_12 : f32 to vector<3x128xf32>
    %53 = vector.extract_strided_slice %0 {offsets = [3, 0], sizes = [125, 128], strides = [1, 1]} : vector<128x128xf32> to vector<125x128xf32>
    %54 = tpu.concatenate %53, %52 in 0 : vector<125x128xf32>, vector<3x128xf32> -> vector<128x128xf32>
    %cst_13 = arith.constant 0.000000e+00 : f32
    %55 = vector.broadcast %cst_13 : f32 to vector<128x128xf32>
    %56 = arith.select %51, %54, %55 : vector<128x128xi1>, vector<128x128xf32>
    %57 = arith.addf %49, %56 : vector<128x128xf32>
    %c3_i32 = arith.constant 3 : i32
    %58 = vector.broadcast %c3_i32 : i32 to vector<128x128xi32>
    %59 = arith.cmpi sge, %17, %58 : vector<128x128xi32>
    %cst_14 = arith.constant 0.000000e+00 : f32
    %60 = vector.broadcast %cst_14 : f32 to vector<3x128xf32>
    %61 = vector.extract_strided_slice %0 {offsets = [0, 0], sizes = [125, 128], strides = [1, 1]} : vector<128x128xf32> to vector<125x128xf32>
    %62 = tpu.concatenate %60, %61 in 0 : vector<3x128xf32>, vector<125x128xf32> -> vector<128x128xf32>
    %cst_15 = arith.constant 0.000000e+00 : f32
    %63 = vector.broadcast %cst_15 : f32 to vector<128x128xf32>
    %64 = arith.select %59, %62, %63 : vector<128x128xi1>, vector<128x128xf32>
    %65 = arith.addf %57, %64 : vector<128x128xf32>
    %cst_16 = arith.constant 7.000000e+00 : f32
    %66 = vector.broadcast %cst_16 : f32 to vector<128x128xf32>
    %67 = arith.divf %65, %66 : vector<128x128xf32>
    %c0_17 = arith.constant 0 : index
    %c0_18 = arith.constant 0 : index
    %68 = vector.load %arg2[%c0_17, %c0_18] : memref<128x128xf32, #tpu.memory_space<vmem>>, vector<128x128xf32>
    tpu.vector_store %arg2[%c0_17, %c0_18], %67 {strides = array<i32>} : memref<128x128xf32, #tpu.memory_space<vmem>>, vector<128x128xf32>,
    %69 = arith.subf %0, %67 : vector<128x128xf32>
    %c0_19 = arith.constant 0 : index
    %c0_20 = arith.constant 0 : index
    %70 = vector.load %arg1[%c0_19, %c0_20] : memref<128x128xf32, #tpu.memory_space<vmem>>, vector<128x128xf32>
    tpu.vector_store %arg1[%c0_19, %c0_20], %69 {strides = array<i32>} : memref<128x128xf32, #tpu.memory_space<vmem>>, vector<128x128xf32>,
    return
  }
}

</mosaic_0001>

<bundles_post_ra>
// kernel: _decompose.1
= control target key start
LH: loop header
LB: loop body
LE: loop exit
PB: predicated region body
PF: predicated region fallthrough
CT: control target
= control target key end

     0   :  { %8 = vsyncpa [#allocation3], 0  ;;  %s1442_s0 = inlined_call_operand.hbm [shape: f32[128,128], index: 0, kind: input, shape index: {}]   ;;  %s1443_s1 = inlined_call_operand.hbm [shape: f32[128,128], index: 1, kind: output, shape index: {0}]   ;;  %s1444_s2 = inlined_call_operand.hbm [shape: f32[128,128], index: 2, kind: output, shape index: {1}]  }
   0x1   :  { %9 = vsyncpa [#allocation4], 0 }
   0x2   :  { %10 = vsyncpa [#allocation7], 0  ;;  %s15_s11 = sshll.u32 %s1442_s0, 4  ;;  %s933_s12 = smov [#allocation2]   ;;  %s16_s11 = int_to_ptr.hbm [resolvable:$true] %s15_s11 }
   0x3   :  { %s17_s13 = sshll.u32 %s933_s12, 4  ;;  %s934_s14 = smov 128   ;;  %s18_s13 = int_to_ptr.vmem [resolvable:$true] %s17_s13 }
   0x4   :  { %s935_s15 = smov 8  }
   0x5   :  { %23 = dma.hbm_to_vmem [thread:$0]  %s16_s11, 2048, %s18_s13, [#allocation3], %s934_s14, %s934_s14, %s935_s15  }
   0x6   :  { %927 = dma.done.wait [#allocation3], 2048  }
   0x7   :  { %928 = vsyncadd [#allocation3], 4294965248  ;;  %v44_v0 = vlaneseq  ;;  %v936_v3 = vmov 7.0   ;;  %v970_v5 = vld [vmem:[#allocation2] sm:$0xff]  ;;  %v972_v6 = vld [vmem:[#allocation2 + $0x8] sm:$0xff]  ;;  %s937_s0 = smov [#allocation6]  }
   0x8   :  { %853 = vrcp.f32 %v936_v3  ;;  %v974_v7 = vld [vmem:[#allocation2 + $0x78] sm:$0xff]  ;;  %v269_v9 = vrot.slane %v970_v5, 1  ;;  %v270_v10 = vrot.slane %v972_v6, 1  ;;  %v350_v11 = vrot.slane %v970_v5, 7  ;;  %v996_v22 = vld [vmem:[#allocation2 + $0x10] sm:$0xff]  ;;  %v1044_v59 = vld [vmem:[#allocation2 + $0x20] sm:$0xff] }
   0x9   :  { %v960_v1 = vshrl.u32 %v44_v0, 7  ;;  %v365_v12 = vrot.slane %v974_v7, 7  ;;  %v431_v13 = vrot.slane %v970_v5, 2  ;;  %v432_v14 = vrot.slane %v972_v6, 2  ;;  %v1026_v42 = vld [vmem:[#allocation2 + $0x18] sm:$0xff]  ;;  %s827_s16 = sshll.u32 %s937_s0, 4  ;;  %s828_s16 = int_to_ptr.vmem [resolvable:$true] %s827_s16 }
   0xa   :  { %v512_v15 = vrot.slane %v970_v5, 6  ;;  %v527_v16 = vrot.slane %v974_v7, 6  ;;  %v593_v20 = vrot.slane %v970_v5, 3  ;;  %v594_v21 = vrot.slane %v972_v6, 3  ;;  %s829_s19 = sshll.u32 %s1444_s2, 4  ;;  %s938_s20 = smov [#allocation5]   ;;  %s830_s19 = int_to_ptr.hbm [resolvable:$true] %s829_s19 }
   0xb   :  { %v65_v2 = vand.u32 63, %v960_v1  ;;  %vm285_vm0 = vcmp.lt.s32.totalorder %v960_v1, 7  ;;  %vm366_vm1 = vcmp.lt.s32.totalorder %v960_v1, 1  ;;  %vm447_vm2 = vcmp.lt.s32.totalorder %v960_v1, 6  ;;  %s814_s21 = sshll.u32 %s938_s20, 4  ;;  %s816_s24 = sshll.u32 %s1443_s1, 4  ;;  %s815_s21 = int_to_ptr.vmem [resolvable:$true] %s814_s21  ;;  %s817_s24 = int_to_ptr.hbm [resolvable:$true] %s816_s24 }
   0xc   :  { %v52_v4 = vadd.s32 56, %v960_v1  ;;  %vm528_vm4 = vcmp.lt.s32.totalorder %v960_v1, 2  ;;  %vm609_vm5 = vcmp.lt.s32.totalorder %v960_v1, 5  ;;  %vm690_vm6 = vcmp.lt.s32.totalorder %v960_v1, 3 }
   0xd   :  { %vm334_vm3 = vcmp.ge.s32.totalorder %v65_v2, 1  ;;  %vm496_vm7 = vcmp.ge.s32.totalorder %v65_v2, 2  ;;  %vm658_vm8 = vcmp.ge.s32.totalorder %v65_v2, 3  ;;  %v300_v18 = vsel %vm285_vm0, %v269_v9, %v270_v10 }
   0xe   :  { %v976_v8 = vand.u32 63, %v52_v4  ;;  %v854_v17 = vpop.eup %853  ;;  %v382_v19 = vsel %vm366_vm1, %v365_v12, %v350_v11  ;;  %v318_v23 = vadd.f32 %v300_v18, %v970_v5  ;;  %v462_v25 = vsel %vm447_vm2, %v431_v13, %v432_v14 }
   0xf   :  { %v383_v24 = vsel %vm334_vm3, %v382_v19, 0.0  ;;  %v544_v26 = vsel %vm528_vm4, %v527_v16, %v512_v15  ;;  %v624_v28 = vsel %vm609_vm5, %v593_v20, %v594_v21  ;;  %v674_v29 = vrot.slane %v970_v5, 5 }
  0x10   :  { %v545_v27 = vsel %vm496_vm7, %v544_v26, 0.0  ;;  %v689_v30 = vrot.slane %v974_v7, 5  ;;  %v399_v31 = vadd.f32 %v383_v24, %v318_v23  ;;  %v740_v32 = vmul.f32 7.0, %v854_v17 }
  0x11   :  { %vm744_vm9 = vweird.f32 %v854_v17  ;;  %v271_v33 = vrot.slane %v996_v22, 1  ;;  %v351_v35 = vrot.slane %v972_v6, 7  ;;  %v433_v36 = vrot.slane %v996_v22, 2 }
  0x12   :  { %v706_v34 = vsel %vm690_vm6, %v689_v30, %v674_v29  ;;  %v513_v37 = vrot.slane %v972_v6, 6  ;;  %v480_v38 = vadd.f32 %v462_v25, %v399_v31  ;;  %v741_v40 = vsub.f32 1.0, %v740_v32 }
  0x13   :  { %v707_v39 = vsel %vm658_vm8, %v706_v34, 0.0  ;;  %v299_v41 = vsel %vm285_vm0, %v270_v10, %v271_v33  ;;  %v381_v44 = vsel %vm366_vm1, %v350_v11, %v351_v35  ;;  %v461_v45 = vsel %vm447_vm2, %v432_v14, %v433_v36 }
  0x14   :  { %v319_v43 = vadd.f32 %v299_v41, %v972_v6  ;;  %v543_v46 = vsel %vm528_vm4, %v512_v15, %v513_v37  ;;  %v561_v47 = vadd.f32 %v545_v27, %v480_v38  ;;  %v742_v48 = vmul.f32 %v854_v17, %v741_v40  ;;  %v1072_v27 = vld [vmem:[#allocation2 + $0x28] sm:$0xff] }
  0x15   :  { %v595_v49 = vrot.slane %v996_v22, 3  ;;  %v675_v50 = vrot.slane %v972_v6, 5  ;;  %v272_v52 = vrot.slane %v1026_v42, 1  ;;  %v352_v53 = vrot.slane %v996_v22, 7 }
  0x16   :  { %v400_v51 = vadd.f32 %v381_v44, %v319_v43  ;;  %v434_v54 = vrot.slane %v1026_v42, 2  ;;  %v642_v55 = vadd.f32 %v624_v28, %v561_v47  ;;  %v743_v56 = vadd.f32 %v854_v17, %v742_v48 }
  0x17   :  { %v623_v57 = vsel %vm609_vm5, %v594_v21, %v595_v49  ;;  %v705_v58 = vsel %vm690_vm6, %v674_v29, %v675_v50  ;;  %v298_v61 = vsel %vm285_vm0, %v271_v33, %v272_v52  ;;  %v380_v62 = vsel %vm366_vm1, %v351_v35, %v352_v53 }
  0x18   :  { %v481_v60 = vadd.f32 %v461_v45, %v400_v51  ;;  %v460_v63 = vsel %vm447_vm2, %v433_v36, %v434_v54  ;;  %v723_v0 = vadd.f32 %v707_v39, %v642_v55  ;;  %v1053_v2 = vsel %vm744_vm9, %v854_v17, %v743_v56 }
  0x19   :  { %v320_v3 = vadd.f32 %v298_v61, %v996_v22  ;;  %v514_v4 = vrot.slane %v996_v22, 6  ;;  %v596_v11 = vrot.slane %v1026_v42, 3  ;;  %v676_v14 = vrot.slane %v996_v22, 5 }
  0x1a   :  { %v562_v10 = vadd.f32 %v543_v46, %v481_v60  ;;  %v273_v15 = vrot.slane %v1044_v59, 1  ;;  %v1061_v18 = vmul.f32 %v1053_v2, %v723_v0  ;;  %v353_v17 = vrot.slane %v1026_v42, 7 }
  0x1b   :  { %v401_v19 = vadd.f32 %v380_v62, %v320_v3  ;;  %v542_v21 = vsel %vm528_vm4, %v513_v37, %v514_v4  ;;  %v622_v24 = vsel %vm609_vm5, %v595_v49, %v596_v11  ;;  %v704_v25 = vsel %vm690_vm6, %v675_v50, %v676_v14 }
  0x1c   :  { %v643_v23 = vadd.f32 %v623_v57, %v562_v10  ;;  %v297_v26 = vsel %vm285_vm0, %v272_v52, %v273_v15  ;;  %762 = vst [vmem:[#allocation6] sm:$0xff] %v1061_v18  ;;  %v379_v31 = vsel %vm366_vm1, %v352_v53, %v353_v17  ;;  %v435_v32 = vrot.slane %v1044_v59, 2 }
  0x1d   :  { %v482_v28 = vadd.f32 %v460_v63, %v401_v19  ;;  %v321_v29 = vadd.f32 %v297_v26, %v1026_v42  ;;  %v515_v34 = vrot.slane %v1026_v42, 6  ;;  %v597_v35 = vrot.slane %v1044_v59, 3 }
  0x1e   :  { %v724_v33 = vadd.f32 %v705_v58, %v643_v23  ;;  %v677_v36 = vrot.slane %v1026_v42, 5  ;;  %v459_v39 = vsel %vm447_vm2, %v434_v54, %v435_v32  ;;  %v274_v40 = vrot.slane %v1072_v27, 1  ;;  %v1102_v54 = vld [vmem:[#allocation2 + $0x30] sm:$0xff] }
  0x1f   :  { %v563_v37 = vadd.f32 %v542_v21, %v482_v28  ;;  %v402_v38 = vadd.f32 %v379_v31, %v321_v29  ;;  %v541_v43 = vsel %vm528_vm4, %v514_v4, %v515_v34  ;;  %v621_v44 = vsel %vm609_vm5, %v596_v11, %v597_v35 }
  0x20   :  { %v1086_v41 = vmul.f32 %v1053_v2, %v724_v33  ;;  %v703_v45 = vsel %vm690_vm6, %v676_v14, %v677_v36  ;;  %v296_v48 = vsel %vm285_vm0, %v273_v15, %v274_v40  ;;  %v354_v49 = vrot.slane %v1044_v59, 7 }
  0x21   :  { %v644_v46 = vadd.f32 %v622_v24, %v563_v37  ;;  %v483_v47 = vadd.f32 %v459_v39, %v402_v38  ;;  %v322_v50 = vadd.f32 %v296_v48, %v1044_v59  ;;  %v436_v51 = vrot.slane %v1072_v27, 2 }
  0x22   :  { %763 = vst [vmem:[#allocation6 + $0x8] sm:$0xff] %v1086_v41  ;;  %v516_v52 = vrot.slane %v1044_v59, 6  ;;  %v598_v53 = vrot.slane %v1072_v27, 3  ;;  %v378_v57 = vsel %vm366_vm1, %v353_v17, %v354_v49  ;;  %v678_v58 = vrot.slane %v1044_v59, 5 }
  0x23   :  { %v725_v55 = vadd.f32 %v704_v25, %v644_v46  ;;  %v564_v56 = vadd.f32 %v541_v43, %v483_v47  ;;  %v403_v60 = vadd.f32 %v378_v57, %v322_v50  ;;  %v458_v61 = vsel %vm447_vm2, %v435_v32, %v436_v51  ;;  %v1127_v25 = vld [vmem:[#allocation2 + $0x38] sm:$0xff]  ;;  %v1154_v50 = vld [vmem:[#allocation2 + $0x40] sm:$0xff] }
  0x24   :  { %v540_v62 = vsel %vm528_vm4, %v515_v34, %v516_v52  ;;  %v620_v63 = vsel %vm609_vm5, %v597_v35, %v598_v53  ;;  %v702_v4 = vsel %vm690_vm6, %v677_v36, %v678_v58  ;;  %v275_v10 = vrot.slane %v1102_v54, 1 }
  0x25   :  { %v1114_v0 = vmul.f32 %v1053_v2, %v725_v55  ;;  %v645_v3 = vadd.f32 %v621_v44, %v564_v56  ;;  %v484_v11 = vadd.f32 %v458_v61, %v403_v60  ;;  %v355_v14 = vrot.slane %v1072_v27, 7 }
  0x26   :  { %v437_v15 = vrot.slane %v1102_v54, 2  ;;  %v517_v19 = vrot.slane %v1072_v27, 6  ;;  %v295_v17 = vsel %vm285_vm0, %v274_v40, %v275_v10  ;;  %v599_v23 = vrot.slane %v1102_v54, 3 }
  0x27   :  { %764 = vst [vmem:[#allocation6 + $0x10] sm:$0xff] %v1114_v0  ;;  %v726_v21 = vadd.f32 %v703_v45, %v645_v3  ;;  %v679_v24 = vrot.slane %v1072_v27, 5  ;;  %v565_v26 = vadd.f32 %v540_v62, %v484_v11  ;;  %v323_v28 = vadd.f32 %v295_v17, %v1072_v27 }
  0x28   :  { %v377_v29 = vsel %vm366_vm1, %v354_v49, %v355_v14  ;;  %v457_v31 = vsel %vm447_vm2, %v436_v51, %v437_v15  ;;  %v539_v33 = vsel %vm528_vm4, %v516_v52, %v517_v19  ;;  %v619_v34 = vsel %vm609_vm5, %v598_v53, %v599_v23 }
  0x29   :  { %v1135_v32 = vmul.f32 %v1053_v2, %v726_v21  ;;  %v701_v35 = vsel %vm690_vm6, %v678_v58, %v679_v24  ;;  %v646_v36 = vadd.f32 %v620_v63, %v565_v26  ;;  %v404_v37 = vadd.f32 %v377_v29, %v323_v28 }
  0x2a   :  { %v276_v38 = vrot.slane %v1127_v25, 1  ;;  %v356_v39 = vrot.slane %v1102_v54, 7  ;;  %v438_v40 = vrot.slane %v1127_v25, 2  ;;  %v518_v43 = vrot.slane %v1102_v54, 6 }
  0x2b   :  { %765 = vst [vmem:[#allocation6 + $0x18] sm:$0xff] %v1135_v32  ;;  %v600_v44 = vrot.slane %v1127_v25, 3  ;;  %v680_v45 = vrot.slane %v1102_v54, 5  ;;  %v727_v46 = vadd.f32 %v702_v4, %v646_v36  ;;  %v485_v47 = vadd.f32 %v457_v31, %v404_v37 }
  0x2c   :  { %v294_v48 = vsel %vm285_vm0, %v275_v10, %v276_v38  ;;  %v376_v49 = vsel %vm366_vm1, %v355_v14, %v356_v39  ;;  %v456_v52 = vsel %vm447_vm2, %v437_v15, %v438_v40  ;;  %v538_v53 = vsel %vm528_vm4, %v517_v19, %v518_v43 }
  0x2d   :  { %v324_v51 = vadd.f32 %v294_v48, %v1102_v54  ;;  %v618_v55 = vsel %vm609_vm5, %v599_v23, %v600_v44  ;;  %v1164_v56 = vmul.f32 %v1053_v2, %v727_v46  ;;  %v566_v57 = vadd.f32 %v539_v33, %v485_v47 }
  0x2e   :  { %v700_v58 = vsel %vm690_vm6, %v679_v24, %v680_v45  ;;  %vm260_vm10 = vcmp.lt.s32.totalorder %v976_v8, 63  ;;  %v277_v61 = vrot.slane %v1154_v50, 1  ;;  %v357_v62 = vrot.slane %v1127_v25, 7  ;;  %v1185_v24 = vld [vmem:[#allocation2 + $0x48] sm:$0xff] }
  0x2f   :  { %v405_v60 = vadd.f32 %v376_v49, %v324_v51  ;;  %vm422_vm11 = vcmp.lt.s32.totalorder %v976_v8, 62  ;;  %766 = vst [vmem:[#allocation6 + $0x20] sm:$0xff] %v1164_v56  ;;  %v647_v63 = vadd.f32 %v619_v34, %v566_v57  ;;  %v439_v3 = vrot.slane %v1154_v50, 2 }
  0x30   :  { %v519_v4 = vrot.slane %v1127_v25, 6  ;;  %vm584_vm12 = vcmp.lt.s32.totalorder %v976_v8, 61  ;;  %v293_v11 = vsel %vm285_vm0, %v276_v38, %v277_v61  ;;  %v375_v14 = vsel %vm366_vm1, %v356_v39, %v357_v62 }
  0x31   :  { %v486_v10 = vadd.f32 %v456_v52, %v405_v60  ;;  %v601_v15 = vrot.slane %v1154_v50, 3  ;;  %v728_v19 = vadd.f32 %v701_v35, %v647_v63  ;;  %v309_v21 = vsel %vm260_vm10, %v293_v11, 0.0 }
  0x32   :  { %v455_v17 = vsel %vm447_vm2, %v438_v40, %v439_v3  ;;  %v537_v23 = vsel %vm528_vm4, %v518_v43, %v519_v4  ;;  %v325_v28 = vadd.f32 %v309_v21, %v1127_v25  ;;  %v681_v35 = vrot.slane %v1127_v25, 5 }
  0x33   :  { %v567_v26 = vadd.f32 %v538_v53, %v486_v10  ;;  %v471_v29 = vsel %vm422_vm11, %v455_v17, 0.0  ;;  %v617_v31 = vsel %vm609_vm5, %v600_v44, %v601_v15  ;;  %v1193_v33 = vmul.f32 %v1053_v2, %v728_v19 }
  0x34   :  { %v633_v34 = vsel %vm584_vm12, %v617_v31, 0.0  ;;  %v53_v36 = vadd.s32 64, %v960_v1  ;;  %v406_v38 = vadd.f32 %v375_v14, %v325_v28  ;;  %v278_v39 = vrot.slane %v1185_v24, 1  ;;  %v1233_v31 = vld [vmem:[#allocation2 + $0x58] sm:$0xff] }
  0x35   :  { %v648_v37 = vadd.f32 %v618_v55, %v567_v26  ;;  %v358_v40 = vrot.slane %v1154_v50, 7  ;;  %767 = vst [vmem:[#allocation6 + $0x28] sm:$0xff] %v1193_v33  ;;  %v699_v8 = vsel %vm690_vm6, %v680_v45, %v681_v35  ;;  %v440_v44 = vrot.slane %v1185_v24, 2  ;;  %v1211_v45 = vld [vmem:[#allocation2 + $0x50] sm:$0xff] }
  0x36   :  { %v121_v43 = vand.u32 63, %v53_v36  ;;  %v520_v46 = vrot.slane %v1154_v50, 6  ;;  %v487_v48 = vadd.f32 %v471_v29, %v406_v38  ;;  %v292_v49 = vsel %vm285_vm0, %v277_v61, %v278_v39 }
  0x37   :  { %v729_v47 = vadd.f32 %v700_v58, %v648_v37  ;;  %v374_v51 = vsel %vm366_vm1, %v357_v62, %v358_v40  ;;  %v326_v52 = vadd.f32 %v292_v49, %v1154_v50  ;;  %v454_v53 = vsel %vm447_vm2, %v439_v3, %v440_v44 }
  0x38   :  { %vm342_vm13 = vcmp.ge.s32.totalorder %v121_v43, 1  ;;  %vm504_vm14 = vcmp.ge.s32.totalorder %v121_v43, 2  ;;  %v568_v57 = vadd.f32 %v537_v23, %v487_v48  ;;  %v536_v60 = vsel %vm528_vm4, %v519_v4, %v520_v46 }
  0x39   :  { %v1214_v55 = vmul.f32 %v1053_v2, %v729_v47  ;;  %v391_v58 = vsel %vm342_vm13, %v374_v51, 0.0  ;;  %v553_v63 = vsel %vm504_vm14, %v536_v60, 0.0  ;;  %v602_v62 = vrot.slane %v1185_v24, 3 }
  0x3a   :  { %v407_v61 = vadd.f32 %v391_v58, %v326_v52  ;;  %vm666_vm15 = vcmp.ge.s32.totalorder %v121_v43, 3  ;;  %v649_v10 = vadd.f32 %v633_v34, %v568_v57  ;;  %v682_v3 = vrot.slane %v1154_v50, 5 }
  0x3b   :  { %768 = vst [vmem:[#allocation6 + $0x30] sm:$0xff] %v1214_v55  ;;  %v279_v11 = vrot.slane %v1211_v45, 1  ;;  %v359_v14 = vrot.slane %v1185_v24, 7  ;;  %v616_v21 = vsel %vm609_vm5, %v601_v15, %v602_v62  ;;  %v441_v4 = vrot.slane %v1211_v45, 2 }
  0x3c   :  { %v488_v19 = vadd.f32 %v454_v53, %v407_v61  ;;  %v521_v17 = vrot.slane %v1185_v24, 6  ;;  %v730_v23 = vadd.f32 %v699_v8, %v649_v10  ;;  %v698_v26 = vsel %vm690_vm6, %v681_v35, %v682_v3 }
  0x3d   :  { %v291_v28 = vsel %vm285_vm0, %v278_v39, %v279_v11  ;;  %v373_v29 = vsel %vm366_vm1, %v358_v40, %v359_v14  ;;  %v715_v37 = vsel %vm666_vm15, %v698_v26, 0.0  ;;  %v453_v38 = vsel %vm447_vm2, %v440_v44, %v441_v4  ;;  %v1251_v44 = vld [vmem:[#allocation2 + $0x60] sm:$0xff] }
  0x3e   :  { %v569_v34 = vadd.f32 %v553_v63, %v488_v19  ;;  %v327_v36 = vadd.f32 %v291_v28, %v1185_v24  ;;  %v1237_v15 = vmul.f32 %v1053_v2, %v730_v23  ;;  %v603_v35 = vrot.slane %v1211_v45, 3 }
  0x3f   :  { %v280_v47 = vrot.slane %v1233_v31, 1  ;;  %v360_v40 = vrot.slane %v1211_v45, 7  ;;  %v535_v48 = vsel %vm528_vm4, %v520_v46, %v521_v17  ;;  %v683_v49 = vrot.slane %v1185_v24, 5 }
  0x40   :  { %v650_v8 = vadd.f32 %v616_v21, %v569_v34  ;;  %v408_v39 = vadd.f32 %v373_v29, %v327_v36  ;;  %769 = vst [vmem:[#allocation6 + $0x38] sm:$0xff] %v1237_v15  ;;  %v442_v43 = vrot.slane %v1233_v31, 2  ;;  %v522_v51 = vrot.slane %v1211_v45, 6  ;;  %v1278_v36 = vld [vmem:[#allocation2 + $0x68] sm:$0xff] }
  0x41   :  { %v290_v57 = vsel %vm285_vm0, %v279_v11, %v280_v47  ;;  %v372_v58 = vsel %vm366_vm1, %v359_v14, %v360_v40  ;;  %v615_v60 = vsel %vm609_vm5, %v602_v62, %v603_v35  ;;  %v604_v63 = vrot.slane %v1233_v31, 3 }
  0x42   :  { %v731_v52 = vadd.f32 %v715_v37, %v650_v8  ;;  %v489_v53 = vadd.f32 %v453_v38, %v408_v39  ;;  %v328_v46 = vadd.f32 %v290_v57, %v1211_v45  ;;  %v452_v61 = vsel %vm447_vm2, %v441_v4, %v442_v43 }
  0x43   :  { %v684_v21 = vrot.slane %v1211_v45, 5  ;;  %v281_v11 = vrot.slane %v1251_v44, 1  ;;  %v697_v14 = vsel %vm690_vm6, %v682_v3, %v683_v49  ;;  %v361_v62 = vrot.slane %v1233_v31, 7 }
  0x44   :  { %v1264_v10 = vmul.f32 %v1053_v2, %v731_v52  ;;  %v570_v19 = vadd.f32 %v535_v48, %v489_v53  ;;  %v409_v23 = vadd.f32 %v372_v58, %v328_v46  ;;  %v443_v26 = vrot.slane %v1251_v44, 2  ;;  %v1299_v46 = vld [vmem:[#allocation2 + $0x70] sm:$0xff] }
  0x45   :  { %v534_v28 = vsel %vm528_vm4, %v521_v17, %v522_v51  ;;  %v289_v29 = vsel %vm285_vm0, %v280_v47, %v281_v11  ;;  %v523_v34 = vrot.slane %v1233_v31, 6  ;;  %v614_v3 = vsel %vm609_vm5, %v603_v35, %v604_v63 }
  0x46   :  { %770 = vst [vmem:[#allocation6 + $0x40] sm:$0xff] %v1264_v10  ;;  %v651_v4 = vadd.f32 %v615_v60, %v570_v19  ;;  %v490_v37 = vadd.f32 %v452_v61, %v409_v23  ;;  %v329_v38 = vadd.f32 %v289_v29, %v1233_v31  ;;  %v371_v8 = vsel %vm366_vm1, %v360_v40, %v361_v62 }
  0x47   :  { %v696_v17 = vsel %vm690_vm6, %v683_v49, %v684_v21  ;;  %v451_v47 = vsel %vm447_vm2, %v442_v43, %v443_v26  ;;  %v605_v48 = vrot.slane %v1251_v44, 3  ;;  %v282_v57 = vrot.slane %v1278_v36, 1 }
  0x48   :  { %v732_v39 = vadd.f32 %v697_v14, %v651_v4  ;;  %v571_v52 = vadd.f32 %v534_v28, %v490_v37  ;;  %v410_v53 = vadd.f32 %v371_v8, %v329_v38  ;;  %v362_v35 = vrot.slane %v1251_v44, 7 }
  0x49   :  { %v533_v40 = vsel %vm528_vm4, %v522_v51, %v523_v34  ;;  %v685_v60 = vrot.slane %v1233_v31, 5  ;;  %v444_v49 = vrot.slane %v1278_v36, 2  ;;  %v288_v19 = vsel %vm285_vm0, %v281_v11, %v282_v57 }
  0x4a   :  { %v1293_v58 = vmul.f32 %v1053_v2, %v732_v39  ;;  %v652_v43 = vadd.f32 %v614_v3, %v571_v52  ;;  %v491_v61 = vadd.f32 %v451_v47, %v410_v53  ;;  %v370_v14 = vsel %vm366_vm1, %v361_v62, %v362_v35 }
  0x4b   :  { %v613_v23 = vsel %vm609_vm5, %v604_v63, %v605_v48  ;;  %v330_v51 = vadd.f32 %v288_v19, %v1251_v44  ;;  %v450_v4 = vsel %vm447_vm2, %v443_v26, %v444_v49  ;;  %v524_v28 = vrot.slane %v1251_v44, 6 }
  0x4c   :  { %771 = vst [vmem:[#allocation6 + $0x48] sm:$0xff] %v1293_v58  ;;  %v733_v29 = vadd.f32 %v696_v17, %v652_v43  ;;  %v572_v37 = vadd.f32 %v533_v40, %v491_v61  ;;  %v606_v3 = vrot.slane %v1278_v36, 3  ;;  %v283_v11 = vrot.slane %v1299_v46, 1 }
  0x4d   :  { %v695_v62 = vsel %vm690_vm6, %v684_v21, %v685_v60  ;;  %v411_v38 = vadd.f32 %v370_v14, %v330_v51  ;;  %v686_v8 = vrot.slane %v1251_v44, 5  ;;  %v363_v63 = vrot.slane %v1278_v36, 7 }
  0x4e   :  { %v1319_v39 = vmul.f32 %v1053_v2, %v733_v29  ;;  %v653_v26 = vadd.f32 %v613_v23, %v572_v37  ;;  %v532_v17 = vsel %vm528_vm4, %v523_v34, %v524_v28  ;;  %v287_v47 = vsel %vm285_vm0, %v282_v57, %v283_v11 }
  0x4f   :  { %v492_v52 = vadd.f32 %v450_v4, %v411_v38  ;;  %v331_v53 = vadd.f32 %v287_v47, %v1278_v36  ;;  %v369_v21 = vsel %vm366_vm1, %v362_v35, %v363_v63  ;;  %v445_v40 = vrot.slane %v1299_v46, 2 }
  0x50   :  { %772 = vst [vmem:[#allocation6 + $0x50] sm:$0xff] %v1319_v39  ;;  %v734_v43 = vadd.f32 %v695_v62, %v653_v26  ;;  %v612_v61 = vsel %vm609_vm5, %v605_v48, %v606_v3  ;;  %v525_v19 = vrot.slane %v1278_v36, 6  ;;  %v607_v34 = vrot.slane %v1299_v46, 3 }
  0x51   :  { %v573_v14 = vadd.f32 %v532_v17, %v492_v52  ;;  %v412_v57 = vadd.f32 %v369_v21, %v331_v53  ;;  %v449_v23 = vsel %vm447_vm2, %v444_v49, %v445_v40  ;;  %v284_v51 = vrot.slane %v974_v7, 1 }
  0x52   :  { %v1338_v35 = vmul.f32 %v1053_v2, %v734_v43  ;;  %v694_v4 = vsel %vm690_vm6, %v685_v60, %v686_v8  ;;  %v531_v48 = vsel %vm528_vm4, %v524_v28, %v525_v19  ;;  %v687_v29 = vrot.slane %v1278_v36, 5 }
  0x53   :  { %v654_v37 = vadd.f32 %v612_v61, %v573_v14  ;;  %v493_v62 = vadd.f32 %v449_v23, %v412_v57  ;;  %v286_v38 = vsel %vm285_vm0, %v283_v11, %v284_v51  ;;  %v364_v49 = vrot.slane %v1299_v46, 7 }
  0x54   :  { %773 = vst [vmem:[#allocation6 + $0x58] sm:$0xff] %v1338_v35  ;;  %v611_v26 = vsel %vm609_vm5, %v606_v3, %v607_v34  ;;  %v332_v17 = vadd.f32 %v286_v38, %v1299_v46  ;;  %v446_v60 = vrot.slane %v974_v7, 2  ;;  %v526_v28 = vrot.slane %v1299_v46, 6 }
  0x55   :  { %v735_v47 = vadd.f32 %v694_v4, %v654_v37  ;;  %v574_v52 = vadd.f32 %v531_v48, %v493_v62  ;;  %v368_v53 = vsel %vm366_vm1, %v363_v63, %v364_v49  ;;  %v608_v11 = vrot.slane %v974_v7, 3 }
  0x56   :  { %v693_v21 = vsel %vm690_vm6, %v686_v8, %v687_v29  ;;  %v413_v43 = vadd.f32 %v368_v53, %v332_v17  ;;  %v448_v3 = vsel %vm447_vm2, %v445_v40, %v446_v60  ;;  %v688_v61 = vrot.slane %v1299_v46, 5 }
  0x57   :  { %v1363_v14 = vmul.f32 %v1053_v2, %v735_v47  ;;  %v655_v57 = vadd.f32 %v611_v26, %v574_v52  ;;  %v530_v23 = vsel %vm528_vm4, %v525_v19, %v526_v28  ;;  %v60_v63 = vadd.s32 120, %v960_v1 }
  0x58   :  { %v494_v4 = vadd.f32 %v448_v3, %v413_v43  ;;  %v610_v8 = vsel %vm609_vm5, %v607_v34, %v608_v11  ;;  %v301_v40 = vsel %vm285_vm0, %v284_v51, %v269_v9  ;;  %v692_v38 = vsel %vm690_vm6, %v687_v29, %v688_v61 }
  0x59   :  { %774 = vst [vmem:[#allocation6 + $0x60] sm:$0xff] %v1363_v14  ;;  %v736_v48 = vadd.f32 %v693_v21, %v655_v57  ;;  %v170_v37 = vand.u32 63, %v60_v63  ;;  %v778_v19 = vsub.f32 %v970_v5, %v1061_v18  ;;  %v779_v26 = vsub.f32 %v972_v6, %v1086_v41 }
  0x5a   :  { %v575_v62 = vadd.f32 %v530_v23, %v494_v4  ;;  %v463_v34 = vsel %vm447_vm2, %v446_v60, %v431_v13  ;;  %v367_v29 = vsel %vm366_vm1, %v364_v49, %v365_v12  ;;  %v780_v18 = vsub.f32 %v996_v22, %v1114_v0 }
  0x5b   :  { %v759_v17 = vmul.f32 %v1053_v2, %v736_v48  ;;  %vm268_vm3 = vcmp.lt.s32.totalorder %v170_v37, 63  ;;  %vm430_vm7 = vcmp.lt.s32.totalorder %v170_v37, 62  ;;  %794 = vst [vmem:[#allocation5] sm:$0xff] %v778_v19  ;;  %v781_v41 = vsub.f32 %v1026_v42, %v1135_v32 }
  0x5c   :  { %v656_v9 = vadd.f32 %v610_v8, %v575_v62  ;;  %v317_v51 = vsel %vm268_vm3, %v301_v40, 0.0  ;;  %v782_v13 = vsub.f32 %v1044_v59, %v1164_v56  ;;  %v479_v47 = vsel %vm430_vm7, %v463_v34, 0.0  ;;  %795 = vst [vmem:[#allocation5 + $0x8] sm:$0xff] %v779_v26 }
  0x5d   :  { %775 = vst [vmem:[#allocation6 + $0x68] sm:$0xff] %v759_v17  ;;  %v333_v6 = vadd.f32 %v317_v51, %v974_v7  ;;  %vm592_vm0 = vcmp.lt.s32.totalorder %v170_v37, 61  ;;  %v625_v12 = vsel %vm609_vm5, %v608_v11, %v593_v20  ;;  %v783_v22 = vsub.f32 %v1072_v27, %v1193_v33 }
  0x5e   :  { %v737_v60 = vadd.f32 %v692_v38, %v656_v9  ;;  %796 = vst [vmem:[#allocation5 + $0x10] sm:$0xff] %v780_v18  ;;  %v529_v42 = vsel %vm528_vm4, %v526_v28, %v527_v16  ;;  %v784_v59 = vsub.f32 %v1102_v54, %v1214_v55  ;;  %v785_v5 = vsub.f32 %v1127_v25, %v1237_v15 }
  0x5f   :  { %v414_v52 = vadd.f32 %v367_v29, %v333_v6  ;;  %797 = vst [vmem:[#allocation5 + $0x18] sm:$0xff] %v781_v41  ;;  %v641_v20 = vsel %vm592_vm0, %v625_v12, 0.0  ;;  %v786_v27 = vsub.f32 %v1154_v50, %v1264_v10  ;;  %v787_v33 = vsub.f32 %v1185_v24, %v1293_v58 }
  0x60   :  { %v760_v0 = vmul.f32 %v1053_v2, %v737_v60  ;;  %798 = vst [vmem:[#allocation5 + $0x20] sm:$0xff] %v782_v13  ;;  %v691_v16 = vsel %vm690_vm6, %v688_v61, %v689_v30  ;;  %v788_v54 = vsub.f32 %v1211_v45, %v1319_v39  ;;  %v789_v55 = vsub.f32 %v1233_v31, %v1338_v35 }
  0x61   :  { %v495_v32 = vadd.f32 %v479_v47, %v414_v52  ;;  %799 = vst [vmem:[#allocation5 + $0x28] sm:$0xff] %v783_v22  ;;  %v790_v50 = vsub.f32 %v1251_v44, %v1363_v14  ;;  %v791_v30 = vsub.f32 %v1278_v36, %v759_v17 }
  0x62   :  { %776 = vst [vmem:[#allocation6 + $0x70] sm:$0xff] %v760_v0  ;;  %v792_v45 = vsub.f32 %v1299_v46, %v760_v0 }
  0x63   :  { %v576_v56 = vadd.f32 %v529_v42, %v495_v32  ;;  %800 = vst [vmem:[#allocation5 + $0x30] sm:$0xff] %v784_v59 }
  0x64   :  { %801 = vst [vmem:[#allocation5 + $0x38] sm:$0xff] %v785_v5 }
  0x65   :  { %v657_v25 = vadd.f32 %v641_v20, %v576_v56  ;;  %802 = vst [vmem:[#allocation5 + $0x40] sm:$0xff] %v786_v27 }
  0x66   :  { %803 = vst [vmem:[#allocation5 + $0x48] sm:$0xff] %v787_v33 }
  0x67   :  { %v738_v1 = vadd.f32 %v691_v16, %v657_v25  ;;  %804 = vst [vmem:[#allocation5 + $0x50] sm:$0xff] %v788_v54 }
  0x68   :  { %805 = vst [vmem:[#allocation5 + $0x58] sm:$0xff] %v789_v55 }
  0x69   :  { %v761_v24 = vmul.f32 %v1053_v2, %v738_v1  ;;  %806 = vst [vmem:[#allocation5 + $0x60] sm:$0xff] %v790_v50 }
  0x6a   :  { %807 = vst [vmem:[#allocation5 + $0x68] sm:$0xff] %v791_v30 }
  0x6b   :  { %777 = vst [vmem:[#allocation6 + $0x78] sm:$0xff] %v761_v24  ;;  %v793_v31 = vsub.f32 %v974_v7, %v761_v24 }
  0x6c   :  { %835 = dma.vmem_to_hbm [thread:$0]  %s828_s16, 2048, %s830_s19, [#allocation7], %s934_s14, %s934_s14, %s935_s15   ;;  %808 = vst [vmem:[#allocation5 + $0x70] sm:$0xff] %v792_v45 }
  0x6d   :  { %809 = vst [vmem:[#allocation5 + $0x78] sm:$0xff] %v793_v31 }
  0x6e   :  { %822 = dma.vmem_to_hbm [thread:$0]  %s815_s21, 2048, %s817_s24, [#allocation4], %s934_s14, %s934_s14, %s935_s15  }
  0x6f   :  { %929 = dma.done.wait [#allocation4], 2048  }
  0x70   :  { %930 = vsyncadd [#allocation4], 4294965248 }
  0x71   :  { %931 = dma.done.wait [#allocation7], 2048  }
  0x72   :  { %932 = vsyncadd [#allocation7], 4294965248 }
  0x73   :  { %844 = vsyncpa [#allocation3], 1 }
  0x74   :  { %845 = vsyncpa [#allocation4], 1 }
  0x75   :  { %846 = vsyncpa [#allocation7], 1 }

// kernel: _decompose.1
= control target key start
LH: loop header
LB: loop body
LE: loop exit
PB: predicated region body
PF: predicated region fallthrough
CT: control target
= control target key end

     0   :  { %8 = vsyncpa [#allocation3], 0  ;;  %s1425_s0 = inlined_call_operand.hbm [shape: f32[128,128], index: 0, kind: input, shape index: {}]   ;;  %s1426_s1 = inlined_call_operand.hbm [shape: f32[128,128], index: 1, kind: output, shape index: {0}]   ;;  %s1427_s2 = inlined_call_operand.hbm [shape: f32[128,128], index: 2, kind: output, shape index: {1}]  }
   0x1   :  { %9 = vsyncpa [#allocation4], 0 }
   0x2   :  { %10 = vsyncpa [#allocation7], 0  ;;  %s15_s11 = sshll.u32 %s1425_s0, 4  ;;  %s1045_s12 = smov [#allocation2]   ;;  %s16_s11 = int_to_ptr.hbm [resolvable:$true] %s15_s11 }
   0x3   :  { %s17_s13 = sshll.u32 %s1045_s12, 4  ;;  %s1046_s14 = smov 128   ;;  %s18_s13 = int_to_ptr.vmem [resolvable:$true] %s17_s13 }
   0x4   :  { %s1047_s15 = smov 8  }
   0x5   :  { %23 = dma.hbm_to_vmem [thread:$0]  %s16_s11, 2048, %s18_s13, [#allocation3], %s1046_s14, %s1046_s14, %s1047_s15  }
   0x6   :  { %1039 = dma.done.wait [#allocation3], 2048  }
   0x7   :  { %1040 = vsyncadd [#allocation3], 4294965248  ;;  %v44_v0 = vlaneseq  ;;  %v1048_v2 = vmov 7.0   ;;  %vm285_vm0 = vcmask 1046528   ;;  %vm382_vm1 = vcmask 1040384   ;;  %v1075_v4 = vld [vmem:[#allocation2] sm:$0xff] }
   0x8   :  { %965 = vrcp.f32 %v1048_v2  ;;  %vm479_vm2 = vcmask 1045504   ;;  %vm576_vm3 = vcmask 1041408   ;;  %vm673_vm4 = vcmask 1044480   ;;  %v1077_v5 = vld [vmem:[#allocation2 + $0x8] sm:$0xff]  ;;  %v1091_v20 = vld [vmem:[#allocation2 + $0x10] sm:$0xff]  ;;  %v1110_v41 = vld [vmem:[#allocation2 + $0x18] sm:$0xff] }
   0x9   :  { %v1072_v1 = vshrl.u32 %v44_v0, 7  ;;  %vm770_vm5 = vcmask 1042432   ;;  %v286_v8 = vrot.slane %v1075_v4, 1  ;;  %v287_v9 = vrot.slane %v1077_v5, 1  ;;  %v1123_v57 = vld [vmem:[#allocation2 + $0x20] sm:$0xff]  ;;  %s1049_s0 = smov [#allocation6]  }
   0xa   :  { %v383_v10 = vrot.slane %v1075_v4, 7  ;;  %v480_v11 = vrot.slane %v1075_v4, 2  ;;  %v481_v12 = vrot.slane %v1077_v5, 2  ;;  %v577_v13 = vrot.slane %v1075_v4, 6  ;;  %s939_s16 = sshll.u32 %s1049_s0, 4  ;;  %s941_s19 = sshll.u32 %s1427_s2, 4  ;;  %s940_s16 = int_to_ptr.vmem [resolvable:$true] %s939_s16  ;;  %s942_s19 = int_to_ptr.hbm [resolvable:$true] %s941_s19 }
   0xb   :  { %v65_v3 = vand.u32 63, %v1072_v1  ;;  %v52_v6 = vadd.s32 56, %v1072_v1  ;;  %v674_v14 = vrot.slane %v1075_v4, 3  ;;  %v675_v15 = vrot.slane %v1077_v5, 3  ;;  %s1050_s2 = smov [#allocation5]   ;;  %s928_s23 = sshll.u32 %s1426_s1, 4  ;;  %s929_s23 = int_to_ptr.hbm [resolvable:$true] %s928_s23 }
   0xc   :  { %v288_v16 = vsel %vm285_vm0, %v286_v8, %v287_v9  ;;  %v430_v17 = vsel %vm382_vm1, 0.0, %v383_v10  ;;  %v771_v18 = vrot.slane %v1075_v4, 5  ;;  %v624_v23 = vsel %vm576_vm3, 0.0, %v577_v13  ;;  %s926_s20 = sshll.u32 %s1050_s2, 4  ;;  %s927_s20 = int_to_ptr.vmem [resolvable:$true] %s926_s20 }
   0xd   :  { %vm366_vm6 = vcmp.ge.s32.totalorder %v65_v3, 1  ;;  %vm560_vm7 = vcmp.ge.s32.totalorder %v65_v3, 2  ;;  %vm754_vm8 = vcmp.ge.s32.totalorder %v65_v3, 3  ;;  %v350_v21 = vadd.f32 %v288_v16, %v1075_v4 }
   0xe   :  { %v966_v7 = vpop.eup %965  ;;  %v431_v22 = vsel %vm366_vm6, %v430_v17, 0.0  ;;  %v1096_v24 = vand.u32 63, %v52_v6  ;;  %v482_v25 = vsel %vm479_vm2, %v480_v11, %v481_v12  ;;  %v625_v26 = vsel %vm560_vm7, %v624_v23, 0.0  ;;  %v1144_v17 = vld [vmem:[#allocation2 + $0x28] sm:$0xff] }
   0xf   :  { %v852_v19 = vmul.f32 7.0, %v966_v7  ;;  %v818_v27 = vsel %vm770_vm5, 0.0, %v771_v18  ;;  %v447_v29 = vadd.f32 %v431_v22, %v350_v21  ;;  %v676_v30 = vsel %vm673_vm4, %v674_v14, %v675_v15 }
  0x10   :  { %v819_v31 = vsel %vm754_vm8, %v818_v27, 0.0  ;;  %v289_v32 = vrot.slane %v1091_v20, 1  ;;  %v384_v34 = vrot.slane %v1077_v5, 7  ;;  %v483_v35 = vrot.slane %v1091_v20, 2 }
  0x11   :  { %v853_v28 = vsub.f32 1.0, %v852_v19  ;;  %v578_v36 = vrot.slane %v1077_v5, 6  ;;  %v544_v37 = vadd.f32 %v482_v25, %v447_v29  ;;  %v677_v39 = vrot.slane %v1091_v20, 3 }
  0x12   :  { %v290_v38 = vsel %vm285_vm0, %v287_v9, %v289_v32  ;;  %v772_v40 = vrot.slane %v1077_v5, 5  ;;  %vm856_vm9 = vweird.f32 %v966_v7  ;;  %v385_v44 = vsel %vm382_vm1, %v383_v10, %v384_v34 }
  0x13   :  { %v854_v33 = vmul.f32 %v966_v7, %v853_v28  ;;  %v351_v43 = vadd.f32 %v290_v38, %v1077_v5  ;;  %v641_v45 = vadd.f32 %v625_v26, %v544_v37  ;;  %v484_v46 = vsel %vm479_vm2, %v481_v12, %v483_v35 }
  0x14   :  { %v579_v47 = vsel %vm576_vm3, %v577_v13, %v578_v36  ;;  %v678_v48 = vsel %vm673_vm4, %v675_v15, %v677_v39  ;;  %v773_v50 = vsel %vm770_vm5, %v771_v18, %v772_v40  ;;  %v291_v51 = vrot.slane %v1110_v41, 1 }
  0x15   :  { %v855_v42 = vadd.f32 %v966_v7, %v854_v33  ;;  %v448_v49 = vadd.f32 %v385_v44, %v351_v43  ;;  %v386_v52 = vrot.slane %v1091_v20, 7  ;;  %v738_v53 = vadd.f32 %v676_v30, %v641_v45 }
  0x16   :  { %v485_v54 = vrot.slane %v1110_v41, 2  ;;  %v580_v55 = vrot.slane %v1091_v20, 6  ;;  %v679_v56 = vrot.slane %v1110_v41, 3  ;;  %v292_v60 = vsel %vm285_vm0, %v289_v32, %v291_v51 }
  0x17   :  { %v1126_v58 = vsel %vm856_vm9, %v966_v7, %v855_v42  ;;  %v545_v59 = vadd.f32 %v484_v46, %v448_v49  ;;  %v387_v61 = vsel %vm382_vm1, %v384_v34, %v386_v52  ;;  %v835_v62 = vadd.f32 %v819_v31, %v738_v53 }
  0x18   :  { %v352_v63 = vadd.f32 %v292_v60, %v1091_v20  ;;  %v486_v0 = vsel %vm479_vm2, %v483_v35, %v485_v54  ;;  %v774_v2 = vrot.slane %v1091_v20, 5  ;;  %v581_v6 = vsel %vm576_vm3, %v578_v36, %v580_v55  ;;  %v1161_v36 = vld [vmem:[#allocation2 + $0x30] sm:$0xff]  ;;  %v1180_v60 = vld [vmem:[#allocation2 + $0x38] sm:$0xff] }
  0x19   :  { %v642_v3 = vadd.f32 %v579_v47, %v545_v59  ;;  %v680_v8 = vsel %vm673_vm4, %v677_v39, %v679_v56  ;;  %v293_v7 = vrot.slane %v1123_v57, 1  ;;  %v1137_v9 = vmul.f32 %v1126_v58, %v835_v62 }
  0x1a   :  { %v449_v10 = vadd.f32 %v387_v61, %v352_v63  ;;  %v388_v11 = vrot.slane %v1110_v41, 7  ;;  %v487_v12 = vrot.slane %v1123_v57, 2  ;;  %v582_v15 = vrot.slane %v1110_v41, 6 }
  0x1b   :  { %v739_v13 = vadd.f32 %v678_v48, %v642_v3  ;;  %v294_v14 = vsel %vm285_vm0, %v291_v51, %v293_v7  ;;  %v681_v16 = vrot.slane %v1123_v57, 3  ;;  %874 = vst [vmem:[#allocation6] sm:$0xff] %v1137_v9  ;;  %v775_v19 = vsel %vm770_vm5, %v772_v40, %v774_v2 }
  0x1c   :  { %v546_v18 = vadd.f32 %v486_v0, %v449_v10  ;;  %v353_v21 = vadd.f32 %v294_v14, %v1110_v41  ;;  %v389_v22 = vsel %vm382_vm1, %v386_v52, %v388_v11  ;;  %v488_v25 = vsel %vm479_vm2, %v485_v54, %v487_v12 }
  0x1d   :  { %v836_v23 = vadd.f32 %v773_v50, %v739_v13  ;;  %v583_v26 = vsel %vm576_vm3, %v580_v55, %v582_v15  ;;  %v776_v27 = vrot.slane %v1110_v41, 5  ;;  %v295_v30 = vrot.slane %v1144_v17, 1 }
  0x1e   :  { %v643_v28 = vadd.f32 %v581_v6, %v546_v18  ;;  %v450_v29 = vadd.f32 %v389_v22, %v353_v21  ;;  %v390_v31 = vrot.slane %v1123_v57, 7  ;;  %v682_v33 = vsel %vm673_vm4, %v679_v56, %v681_v16 }
  0x1f   :  { %v1156_v32 = vmul.f32 %v1126_v58, %v836_v23  ;;  %v489_v34 = vrot.slane %v1144_v17, 2  ;;  %v584_v35 = vrot.slane %v1123_v57, 6  ;;  %v296_v39 = vsel %vm285_vm0, %v293_v7, %v295_v30 }
  0x20   :  { %v740_v37 = vadd.f32 %v680_v8, %v643_v28  ;;  %v547_v38 = vadd.f32 %v488_v25, %v450_v29  ;;  %v391_v40 = vsel %vm382_vm1, %v388_v11, %v390_v31  ;;  %v777_v42 = vsel %vm770_vm5, %v774_v2, %v776_v27  ;;  %v1204_v28 = vld [vmem:[#allocation2 + $0x40] sm:$0xff] }
  0x21   :  { %875 = vst [vmem:[#allocation6 + $0x8] sm:$0xff] %v1156_v32  ;;  %v354_v43 = vadd.f32 %v296_v39, %v1123_v57  ;;  %v490_v44 = vsel %vm479_vm2, %v487_v12, %v489_v34  ;;  %v683_v45 = vrot.slane %v1144_v17, 3  ;;  %v585_v48 = vsel %vm576_vm3, %v582_v15, %v584_v35 }
  0x22   :  { %v837_v46 = vadd.f32 %v775_v19, %v740_v37  ;;  %v644_v47 = vadd.f32 %v583_v26, %v547_v38  ;;  %v297_v49 = vrot.slane %v1161_v36, 1  ;;  %v778_v51 = vrot.slane %v1123_v57, 5 }
  0x23   :  { %v451_v50 = vadd.f32 %v391_v40, %v354_v43  ;;  %v392_v52 = vrot.slane %v1144_v17, 7  ;;  %v491_v53 = vrot.slane %v1161_v36, 2  ;;  %v684_v56 = vsel %vm673_vm4, %v681_v16, %v683_v45 }
  0x24   :  { %v1176_v54 = vmul.f32 %v1126_v58, %v837_v46  ;;  %v741_v55 = vadd.f32 %v682_v33, %v644_v47  ;;  %v298_v59 = vsel %vm285_vm0, %v295_v30, %v297_v49  ;;  %v586_v3 = vrot.slane %v1144_v17, 6 }
  0x25   :  { %v548_v61 = vadd.f32 %v490_v44, %v451_v50  ;;  %v355_v62 = vadd.f32 %v298_v59, %v1144_v17  ;;  %v393_v63 = vsel %vm382_vm1, %v390_v31, %v392_v52  ;;  %v492_v0 = vsel %vm479_vm2, %v489_v34, %v491_v53 }
  0x26   :  { %876 = vst [vmem:[#allocation6 + $0x10] sm:$0xff] %v1176_v54  ;;  %v838_v2 = vadd.f32 %v777_v42, %v741_v55  ;;  %v685_v6 = vrot.slane %v1161_v36, 3  ;;  %v780_v8 = vrot.slane %v1144_v17, 5  ;;  %v299_v11 = vrot.slane %v1180_v60, 1  ;;  %v1225_v55 = vld [vmem:[#allocation2 + $0x48] sm:$0xff] }
  0x27   :  { %v645_v7 = vadd.f32 %v585_v48, %v548_v61  ;;  %v452_v10 = vadd.f32 %v393_v63, %v355_v62  ;;  %v394_v12 = vrot.slane %v1161_v36, 7  ;;  %v779_v14 = vsel %vm770_vm5, %v776_v27, %v778_v51 }
  0x28   :  { %v1192_v13 = vmul.f32 %v1126_v58, %v838_v2  ;;  %v587_v15 = vsel %vm576_vm3, %v584_v35, %v586_v3  ;;  %v686_v16 = vsel %vm673_vm4, %v683_v45, %v685_v6  ;;  %v300_v21 = vsel %vm285_vm0, %v297_v49, %v299_v11 }
  0x29   :  { %v742_v18 = vadd.f32 %v684_v56, %v645_v7  ;;  %v549_v19 = vadd.f32 %v492_v0, %v452_v10  ;;  %v395_v22 = vsel %vm382_vm1, %v392_v52, %v394_v12  ;;  %v356_v23 = vadd.f32 %v300_v21, %v1161_v36 }
  0x2a   :  { %877 = vst [vmem:[#allocation6 + $0x18] sm:$0xff] %v1192_v13  ;;  %v493_v25 = vrot.slane %v1180_v60, 2  ;;  %v588_v26 = vrot.slane %v1161_v36, 6  ;;  %v687_v27 = vrot.slane %v1180_v60, 3  ;;  %v781_v31 = vsel %vm770_vm5, %v778_v51, %v780_v8 }
  0x2b   :  { %v839_v29 = vadd.f32 %v779_v14, %v742_v18  ;;  %v646_v30 = vadd.f32 %v587_v15, %v549_v19  ;;  %v782_v33 = vrot.slane %v1161_v36, 5  ;;  %v453_v34 = vadd.f32 %v395_v22, %v356_v23  ;;  %v1248_v23 = vld [vmem:[#allocation2 + $0x50] sm:$0xff] }
  0x2c   :  { %v494_v35 = vsel %vm479_vm2, %v491_v53, %v493_v25  ;;  %v589_v37 = vsel %vm576_vm3, %v586_v3, %v588_v26  ;;  %vm260_vm10 = vcmp.lt.s32.totalorder %v1096_v24, 63  ;;  %v688_v40 = vsel %vm673_vm4, %v685_v6, %v687_v27 }
  0x2d   :  { %v1212_v38 = vmul.f32 %v1126_v58, %v839_v29  ;;  %v743_v39 = vadd.f32 %v686_v16, %v646_v30  ;;  %v301_v42 = vrot.slane %v1204_v28, 1  ;;  %v550_v43 = vadd.f32 %v494_v35, %v453_v34 }
  0x2e   :  { %v396_v44 = vrot.slane %v1180_v60, 7  ;;  %vm470_vm11 = vcmp.lt.s32.totalorder %v1096_v24, 62  ;;  %v495_v45 = vrot.slane %v1204_v28, 2  ;;  %v783_v47 = vsel %vm770_vm5, %v780_v8, %v782_v33 }
  0x2f   :  { %878 = vst [vmem:[#allocation6 + $0x20] sm:$0xff] %v1212_v38  ;;  %v840_v46 = vadd.f32 %v781_v31, %v743_v39  ;;  %v302_v48 = vsel %vm285_vm0, %v299_v11, %v301_v42  ;;  %v590_v49 = vrot.slane %v1180_v60, 6  ;;  %v647_v50 = vadd.f32 %v589_v37, %v550_v43 }
  0x30   :  { %v341_v51 = vsel %vm260_vm10, %v302_v48, 0.0  ;;  %v397_v52 = vsel %vm382_vm1, %v394_v12, %v396_v44  ;;  %v496_v53 = vsel %vm479_vm2, %v493_v25, %v495_v45  ;;  %vm664_vm12 = vcmp.lt.s32.totalorder %v1096_v24, 61 }
  0x31   :  { %v1228_v56 = vmul.f32 %v1126_v58, %v840_v46  ;;  %v357_v59 = vadd.f32 %v341_v51, %v1180_v60  ;;  %v535_v61 = vsel %vm470_vm11, %v496_v53, 0.0  ;;  %v744_v62 = vadd.f32 %v688_v40, %v647_v50 }
  0x32   :  { %v591_v63 = vsel %vm576_vm3, %v588_v26, %v590_v49  ;;  %v689_v0 = vrot.slane %v1204_v28, 3  ;;  %v53_v2 = vadd.s32 64, %v1072_v1  ;;  %v303_v6 = vrot.slane %v1225_v55, 1 }
  0x33   :  { %879 = vst [vmem:[#allocation6 + $0x28] sm:$0xff] %v1228_v56  ;;  %v454_v3 = vadd.f32 %v397_v52, %v357_v59  ;;  %v398_v8 = vrot.slane %v1204_v28, 7  ;;  %v497_v7 = vrot.slane %v1225_v55, 2  ;;  %v841_v10 = vadd.f32 %v783_v47, %v744_v62 }
  0x34   :  { %v690_v11 = vsel %vm673_vm4, %v687_v27, %v689_v0  ;;  %v784_v24 = vrot.slane %v1180_v60, 5  ;;  %v121_v12 = vand.u32 63, %v53_v2  ;;  %v304_v16 = vsel %vm285_vm0, %v301_v42, %v303_v6 }
  0x35   :  { %v551_v14 = vadd.f32 %v535_v61, %v454_v3  ;;  %v729_v15 = vsel %vm664_vm12, %v690_v11, 0.0  ;;  %v399_v18 = vsel %vm382_vm1, %v396_v44, %v398_v8  ;;  %v1244_v19 = vmul.f32 %v1126_v58, %v841_v10 }
  0x36   :  { %v358_v21 = vadd.f32 %v304_v16, %v1204_v28  ;;  %vm374_vm13 = vcmp.ge.s32.totalorder %v121_v12, 1  ;;  %v498_v22 = vsel %vm479_vm2, %v495_v45, %v497_v7  ;;  %vm568_vm14 = vcmp.ge.s32.totalorder %v121_v12, 2  ;;  %v1259_v45 = vld [vmem:[#allocation2 + $0x58] sm:$0xff]  ;;  %v1281_v16 = vld [vmem:[#allocation2 + $0x60] sm:$0xff] }
  0x37   :  { %v648_v25 = vadd.f32 %v591_v63, %v551_v14  ;;  %v439_v26 = vsel %vm374_vm13, %v399_v18, 0.0  ;;  %v592_v27 = vrot.slane %v1204_v28, 6  ;;  %880 = vst [vmem:[#allocation6 + $0x30] sm:$0xff] %v1244_v19  ;;  %v785_v29 = vsel %vm770_vm5, %v782_v33, %v784_v24 }
  0x38   :  { %v455_v30 = vadd.f32 %v439_v26, %v358_v21  ;;  %v691_v31 = vrot.slane %v1225_v55, 3  ;;  %v786_v34 = vrot.slane %v1204_v28, 5  ;;  %v305_v39 = vrot.slane %v1248_v23, 1 }
  0x39   :  { %v745_v35 = vadd.f32 %v729_v15, %v648_v25  ;;  %v593_v37 = vsel %vm576_vm3, %v590_v49, %v592_v27  ;;  %v400_v40 = vrot.slane %v1225_v55, 7  ;;  %vm762_vm15 = vcmp.ge.s32.totalorder %v121_v12, 3 }
  0x3a   :  { %v552_v42 = vadd.f32 %v498_v22, %v455_v30  ;;  %v633_v43 = vsel %vm568_vm14, %v593_v37, 0.0  ;;  %v787_v44 = vsel %vm770_vm5, %v784_v24, %v786_v34  ;;  %v692_v46 = vsel %vm673_vm4, %v689_v0, %v691_v31 }
  0x3b   :  { %v842_v33 = vadd.f32 %v785_v29, %v745_v35  ;;  %v306_v47 = vsel %vm285_vm0, %v303_v6, %v305_v39  ;;  %v401_v48 = vsel %vm382_vm1, %v398_v8, %v400_v40  ;;  %v499_v51 = vrot.slane %v1248_v23, 2 }
  0x3c   :  { %v649_v50 = vadd.f32 %v633_v43, %v552_v42  ;;  %v359_v49 = vadd.f32 %v306_v47, %v1225_v55  ;;  %v594_v52 = vrot.slane %v1225_v55, 6  ;;  %v827_v59 = vsel %vm762_vm15, %v787_v44, 0.0 }
  0x3d   :  { %v1268_v53 = vmul.f32 %v1126_v58, %v842_v33  ;;  %v693_v61 = vrot.slane %v1248_v23, 3  ;;  %v307_v62 = vrot.slane %v1259_v45, 1  ;;  %v500_v2 = vsel %vm479_vm2, %v497_v7, %v499_v51 }
  0x3e   :  { %v746_v63 = vadd.f32 %v692_v46, %v649_v50  ;;  %v456_v0 = vadd.f32 %v401_v48, %v359_v49  ;;  %v788_v3 = vrot.slane %v1225_v55, 5  ;;  %v595_v6 = vsel %vm576_vm3, %v592_v27, %v594_v52  ;;  %v1301_v46 = vld [vmem:[#allocation2 + $0x68] sm:$0xff] }
  0x3f   :  { %881 = vst [vmem:[#allocation6 + $0x38] sm:$0xff] %v1268_v53  ;;  %v694_v8 = vsel %vm673_vm4, %v691_v31, %v693_v61  ;;  %v308_v10 = vsel %vm285_vm0, %v305_v39, %v307_v62  ;;  %v402_v11 = vrot.slane %v1248_v23, 7  ;;  %v501_v15 = vrot.slane %v1259_v45, 2 }
  0x40   :  { %v843_v24 = vadd.f32 %v827_v59, %v746_v63  ;;  %v553_v12 = vadd.f32 %v500_v2, %v456_v0  ;;  %v360_v14 = vadd.f32 %v308_v10, %v1248_v23  ;;  %v596_v18 = vrot.slane %v1248_v23, 6 }
  0x41   :  { %v403_v7 = vsel %vm382_vm1, %v400_v40, %v402_v11  ;;  %v695_v21 = vrot.slane %v1259_v45, 3  ;;  %v790_v22 = vrot.slane %v1248_v23, 5  ;;  %v502_v29 = vsel %vm479_vm2, %v499_v51, %v501_v15 }
  0x42   :  { %v1288_v25 = vmul.f32 %v1126_v58, %v843_v24  ;;  %v650_v26 = vadd.f32 %v595_v6, %v553_v12  ;;  %v457_v27 = vadd.f32 %v403_v7, %v360_v14  ;;  %v789_v30 = vsel %vm770_vm5, %v786_v34, %v788_v3 }
  0x43   :  { %v597_v31 = vsel %vm576_vm3, %v594_v52, %v596_v18  ;;  %v309_v35 = vrot.slane %v1281_v16, 1  ;;  %v404_v40 = vrot.slane %v1259_v45, 7  ;;  %v503_v42 = vrot.slane %v1281_v16, 2 }
  0x44   :  { %882 = vst [vmem:[#allocation6 + $0x40] sm:$0xff] %v1288_v25  ;;  %v747_v37 = vadd.f32 %v694_v8, %v650_v26  ;;  %v554_v39 = vadd.f32 %v502_v29, %v457_v27  ;;  %v696_v43 = vsel %vm673_vm4, %v693_v61, %v695_v21  ;;  %v791_v44 = vsel %vm770_vm5, %v788_v3, %v790_v22 }
  0x45   :  { %v310_v33 = vsel %vm285_vm0, %v307_v62, %v309_v35  ;;  %v598_v34 = vrot.slane %v1259_v45, 6  ;;  %v405_v49 = vsel %vm382_vm1, %v402_v11, %v404_v40  ;;  %v504_v51 = vsel %vm479_vm2, %v501_v15, %v503_v42  ;;  %v1320_v15 = vld [vmem:[#allocation2 + $0x70] sm:$0xff] }
  0x46   :  { %v844_v47 = vadd.f32 %v789_v30, %v747_v37  ;;  %v651_v48 = vadd.f32 %v597_v31, %v554_v39  ;;  %v361_v50 = vadd.f32 %v310_v33, %v1259_v45  ;;  %v697_v59 = vrot.slane %v1281_v16, 3 }
  0x47   :  { %v599_v52 = vsel %vm576_vm3, %v596_v18, %v598_v34  ;;  %v792_v61 = vrot.slane %v1259_v45, 5  ;;  %v311_v2 = vrot.slane %v1301_v46, 1  ;;  %v406_v3 = vrot.slane %v1281_v16, 7 }
  0x48   :  { %v1310_v62 = vmul.f32 %v1126_v58, %v844_v47  ;;  %v748_v63 = vadd.f32 %v696_v43, %v651_v48  ;;  %v458_v0 = vadd.f32 %v405_v49, %v361_v50  ;;  %v505_v6 = vrot.slane %v1301_v46, 2  ;;  %v1337_v47 = vld [vmem:[#allocation2 + $0x78] sm:$0xff] }
  0x49   :  { %v600_v8 = vrot.slane %v1281_v16, 6  ;;  %v699_v10 = vrot.slane %v1301_v46, 3  ;;  %v312_v12 = vsel %vm285_vm0, %v309_v35, %v311_v2  ;;  %v794_v14 = vrot.slane %v1281_v16, 5 }
  0x4a   :  { %883 = vst [vmem:[#allocation6 + $0x48] sm:$0xff] %v1310_v62  ;;  %v845_v11 = vadd.f32 %v791_v44, %v748_v63  ;;  %v555_v24 = vadd.f32 %v504_v51, %v458_v0  ;;  %v698_v7 = vsel %vm673_vm4, %v695_v21, %v697_v59  ;;  %v362_v18 = vadd.f32 %v312_v12, %v1281_v16 }
  0x4b   :  { %v407_v26 = vsel %vm382_vm1, %v404_v40, %v406_v3  ;;  %v793_v30 = vsel %vm770_vm5, %v790_v22, %v792_v61  ;;  %v506_v31 = vsel %vm479_vm2, %v503_v42, %v505_v6  ;;  %v313_v35 = vrot.slane %v1320_v15, 1 }
  0x4c   :  { %v1326_v27 = vmul.f32 %v1126_v58, %v845_v11  ;;  %v652_v29 = vadd.f32 %v599_v52, %v555_v24  ;;  %v459_v37 = vadd.f32 %v407_v26, %v362_v18  ;;  %v408_v39 = vrot.slane %v1301_v46, 7 }
  0x4d   :  { %v507_v43 = vrot.slane %v1320_v15, 2  ;;  %v601_v40 = vsel %vm576_vm3, %v598_v34, %v600_v8  ;;  %v700_v44 = vsel %vm673_vm4, %v697_v59, %v699_v10  ;;  %v795_v33 = vsel %vm770_vm5, %v792_v61, %v794_v14 }
  0x4e   :  { %884 = vst [vmem:[#allocation6 + $0x50] sm:$0xff] %v1326_v27  ;;  %v749_v21 = vadd.f32 %v698_v7, %v652_v29  ;;  %v556_v22 = vadd.f32 %v506_v31, %v459_v37  ;;  %v314_v42 = vsel %vm285_vm0, %v311_v2, %v313_v35  ;;  %v409_v48 = vsel %vm382_vm1, %v406_v3, %v408_v39 }
  0x4f   :  { %v602_v50 = vrot.slane %v1301_v46, 6  ;;  %v363_v51 = vadd.f32 %v314_v42, %v1301_v46  ;;  %v701_v52 = vrot.slane %v1320_v15, 3  ;;  %v796_v34 = vrot.slane %v1301_v46, 5 }
  0x50   :  { %v846_v49 = vadd.f32 %v793_v30, %v749_v21  ;;  %v653_v63 = vadd.f32 %v601_v40, %v556_v22  ;;  %v508_v59 = vsel %vm479_vm2, %v505_v6, %v507_v43  ;;  %v315_v61 = vrot.slane %v1337_v47, 1 }
  0x51   :  { %v410_v0 = vrot.slane %v1320_v15, 7  ;;  %v460_v3 = vadd.f32 %v409_v48, %v363_v51  ;;  %v509_v11 = vrot.slane %v1337_v47, 2  ;;  %v604_v24 = vrot.slane %v1320_v15, 6 }
  0x52   :  { %v1349_v2 = vmul.f32 %v1126_v58, %v846_v49  ;;  %v750_v12 = vadd.f32 %v700_v44, %v653_v63  ;;  %v603_v7 = vsel %vm576_vm3, %v600_v8, %v602_v50  ;;  %v316_v18 = vsel %vm285_vm0, %v313_v35, %v315_v61 }
  0x53   :  { %v411_v26 = vsel %vm382_vm1, %v408_v39, %v410_v0  ;;  %v557_v6 = vadd.f32 %v508_v59, %v460_v3  ;;  %v702_v29 = vsel %vm673_vm4, %v699_v10, %v701_v52  ;;  %v797_v30 = vsel %vm770_vm5, %v794_v14, %v796_v34 }
  0x54   :  { %885 = vst [vmem:[#allocation6 + $0x58] sm:$0xff] %v1349_v2  ;;  %v364_v31 = vadd.f32 %v316_v18, %v1320_v15  ;;  %v847_v37 = vadd.f32 %v795_v33, %v750_v12  ;;  %v510_v21 = vsel %vm479_vm2, %v507_v43, %v509_v11  ;;  %v703_v40 = vrot.slane %v1337_v47, 3 }
  0x55   :  { %v60_v8 = vadd.s32 120, %v1072_v1  ;;  %v654_v44 = vadd.f32 %v603_v7, %v557_v6  ;;  %v605_v39 = vsel %vm576_vm3, %v602_v50, %v604_v24  ;;  %v412_v22 = vrot.slane %v1337_v47, 7 }
  0x56   :  { %v461_v35 = vadd.f32 %v411_v26, %v364_v31  ;;  %v1366_v42 = vmul.f32 %v1126_v58, %v847_v37  ;;  %v798_v10 = vrot.slane %v1320_v15, 5  ;;  %v333_v33 = vsel %vm285_vm0, %v315_v61, 0.0 }
  0x57   :  { %v170_v14 = vand.u32 63, %v60_v8  ;;  %v751_v48 = vadd.f32 %v702_v29, %v654_v44  ;;  %v527_v49 = vsel %vm479_vm2, %v509_v11, 0.0  ;;  %v704_v1 = vsel %vm673_vm4, %v701_v52, %v703_v40 }
  0x58   :  { %v558_v43 = vadd.f32 %v510_v21, %v461_v35  ;;  %886 = vst [vmem:[#allocation6 + $0x60] sm:$0xff] %v1366_v42  ;;  %v413_v50 = vsel %vm382_vm1, %v410_v0, %v412_v22  ;;  %v606_v3 = vrot.slane %v1337_v47, 6  ;;  %v799_v12 = vsel %vm770_vm5, %v796_v34, %v798_v10 }
  0x59   :  { %vm268_vm6 = vcmp.lt.s32.totalorder %v170_v14, 63  ;;  %vm478_vm7 = vcmp.lt.s32.totalorder %v170_v14, 62  ;;  %v848_v51 = vadd.f32 %v797_v30, %v751_v48  ;;  %v890_v52 = vsub.f32 %v1075_v4, %v1137_v9 }
  0x5a   :  { %v655_v63 = vadd.f32 %v605_v39, %v558_v43  ;;  %v349_v59 = vsel %vm268_vm6, %v333_v33, 0.0  ;;  %v543_v7 = vsel %vm478_vm7, %v527_v49, 0.0  ;;  %v891_v0 = vsub.f32 %v1077_v5, %v1156_v32 }
  0x5b   :  { %v365_v61 = vadd.f32 %v349_v59, %v1337_v47  ;;  %v871_v11 = vmul.f32 %v1126_v58, %v848_v51  ;;  %vm672_vm0 = vcmp.lt.s32.totalorder %v170_v14, 61  ;;  %v721_v6 = vsel %vm673_vm4, %v703_v40, 0.0  ;;  %906 = vst [vmem:[#allocation5] sm:$0xff] %v890_v52 }
  0x5c   :  { %v752_v18 = vadd.f32 %v704_v1, %v655_v63  ;;  %v892_v29 = vsub.f32 %v1091_v20, %v1176_v54  ;;  %v607_v30 = vsel %vm576_vm3, %v604_v24, %v606_v3  ;;  %v800_v31 = vrot.slane %v1337_v47, 5  ;;  %907 = vst [vmem:[#allocation5 + $0x8] sm:$0xff] %v891_v0 }
  0x5d   :  { %v462_v26 = vadd.f32 %v413_v50, %v365_v61  ;;  %887 = vst [vmem:[#allocation6 + $0x68] sm:$0xff] %v871_v11  ;;  %v893_v4 = vsub.f32 %v1110_v41, %v1192_v13  ;;  %v737_v9 = vsel %vm672_vm0, %v721_v6, 0.0  ;;  %v894_v32 = vsub.f32 %v1123_v57, %v1212_v38 }
  0x5e   :  { %v849_v34 = vadd.f32 %v799_v12, %v752_v18  ;;  %908 = vst [vmem:[#allocation5 + $0x10] sm:$0xff] %v892_v29  ;;  %v895_v20 = vsub.f32 %v1144_v17, %v1228_v56  ;;  %v801_v54 = vsel %vm770_vm5, %v798_v10, %v800_v31  ;;  %v896_v24 = vsub.f32 %v1161_v36, %v1244_v19 }
  0x5f   :  { %v559_v37 = vadd.f32 %v543_v7, %v462_v26  ;;  %909 = vst [vmem:[#allocation5 + $0x18] sm:$0xff] %v893_v4  ;;  %v897_v41 = vsub.f32 %v1180_v60, %v1268_v53  ;;  %v898_v57 = vsub.f32 %v1204_v28, %v1288_v25  ;;  %v899_v36 = vsub.f32 %v1225_v55, %v1310_v62 }
  0x60   :  { %v872_v5 = vmul.f32 %v1126_v58, %v849_v34  ;;  %910 = vst [vmem:[#allocation5 + $0x20] sm:$0xff] %v894_v32  ;;  %v900_v60 = vsub.f32 %v1248_v23, %v1326_v27  ;;  %v901_v28 = vsub.f32 %v1259_v45, %v1349_v2  ;;  %v902_v38 = vsub.f32 %v1281_v16, %v1366_v42 }
  0x61   :  { %v656_v21 = vadd.f32 %v607_v30, %v559_v37  ;;  %911 = vst [vmem:[#allocation5 + $0x28] sm:$0xff] %v895_v20  ;;  %v903_v56 = vsub.f32 %v1301_v46, %v871_v11 }
  0x62   :  { %888 = vst [vmem:[#allocation6 + $0x70] sm:$0xff] %v872_v5 }
  0x63   :  { %v753_v40 = vadd.f32 %v737_v9, %v656_v21  ;;  %912 = vst [vmem:[#allocation5 + $0x30] sm:$0xff] %v896_v24 }
  0x64   :  { %913 = vst [vmem:[#allocation5 + $0x38] sm:$0xff] %v897_v41 }
  0x65   :  { %v850_v17 = vadd.f32 %v801_v54, %v753_v40  ;;  %914 = vst [vmem:[#allocation5 + $0x40] sm:$0xff] %v898_v57 }
  0x66   :  { %915 = vst [vmem:[#allocation5 + $0x48] sm:$0xff] %v899_v36 }
  0x67   :  { %v873_v13 = vmul.f32 %v1126_v58, %v850_v17  ;;  %916 = vst [vmem:[#allocation5 + $0x50] sm:$0xff] %v900_v60  ;;  %v904_v58 = vsub.f32 %v1320_v15, %v872_v5 }
  0x68   :  { %917 = vst [vmem:[#allocation5 + $0x58] sm:$0xff] %v901_v28 }
  0x69   :  { %889 = vst [vmem:[#allocation6 + $0x78] sm:$0xff] %v873_v13  ;;  %v905_v55 = vsub.f32 %v1337_v47, %v873_v13 }
  0x6a   :  { %947 = dma.vmem_to_hbm [thread:$0]  %s940_s16, 2048, %s942_s19, [#allocation7], %s1046_s14, %s1046_s14, %s1047_s15   ;;  %918 = vst [vmem:[#allocation5 + $0x60] sm:$0xff] %v902_v38 }
  0x6b   :  { %919 = vst [vmem:[#allocation5 + $0x68] sm:$0xff] %v903_v56 }
  0x6c   :  { %920 = vst [vmem:[#allocation5 + $0x70] sm:$0xff] %v904_v58 }
  0x6d   :  { %921 = vst [vmem:[#allocation5 + $0x78] sm:$0xff] %v905_v55 }
  0x6e   :  { %934 = dma.vmem_to_hbm [thread:$0]  %s927_s20, 2048, %s929_s23, [#allocation4], %s1046_s14, %s1046_s14, %s1047_s15  }
  0x6f   :  { %1041 = dma.done.wait [#allocation4], 2048  }
  0x70   :  { %1042 = vsyncadd [#allocation4], 4294965248 }
  0x71   :  { %1043 = dma.done.wait [#allocation7], 2048  }
  0x72   :  { %1044 = vsyncadd [#allocation7], 4294965248 }
  0x73   :  { %956 = vsyncpa [#allocation3], 1 }
  0x74   :  { %957 = vsyncpa [#allocation4], 1 }
  0x75   :  { %958 = vsyncpa [#allocation7], 1 }

</bundles_post_ra>
